<compile_context>
chip_gen: v5e
topology: v5e:2x2
jax: 0.10.0
libtpu: 0.0.40
codegen_flags: <defaults>
</compile_context>

<pallas_src>
import functools

import jax
import jax.numpy as jnp
from jax.experimental import pallas as pl
from jax.experimental.pallas import tpu as pltpu

LOG_STD_MIN = -20.0
LOG_STD_MAX = 2.0

_MIB = 1024 * 1024


def _round_up(x, m):
    return (x + m - 1) // m * m


def _tpu_vmem_capacity_bytes():
    cap = 128 * _MIB
    try:
        info = pltpu.get_tpu_info()
        cap = int(getattr(info, "vmem_capacity_bytes", cap))
    except Exception:
        pass
    return cap


def _vmem_limit_bytes():
    # ~100 MiB on 128 MiB parts (v5e/v6e), ~56 MiB on v7x's 64 MiB per-TC VMEM.
    cap = _tpu_vmem_capacity_bytes()
    return max(32 * _MIB, min(100 * _MIB, cap - 8 * _MIB))


def _default_tile_b():
    # Bigger batch tiles amortize per-step overhead; only safe where VMEM is 128 MiB.
    return 512 if _tpu_vmem_capacity_bytes() >= 128 * _MIB else 256


def _choose_tile_b(B, tile_b_max, min_steps=2):
    """Pick (TILE_B, B_P): multiple of 16, >= min_steps grid steps when possible,
    minimal batch padding, preferring larger tiles at equal padding."""
    B16 = _round_up(max(B, 1), 16)
    cap = max(16, (min(tile_b_max, B16) // 16) * 16)
    cap = min(cap, max(16, _round_up(-(-B16 // min_steps), 16)))
    best_tile, best_bp = 16, _round_up(B16, 16)
    for cand in range(16, cap + 1, 16):
        bp = _round_up(B16, cand)
        if bp <= best_bp:
            best_tile, best_bp = cand, bp
    return best_tile, best_bp


def _resident_spec(shape):
    """Constant-index block (stays in VMEM across the whole grid): single-buffered."""
    index_map = lambda i: (0, 0)
    try:
        return pl.BlockSpec(shape, index_map, pipeline_mode=pl.Buffered(1))
    except (TypeError, AttributeError):
        return pl.BlockSpec(shape, index_map)


def _policy_kernel(
    state_ref,                 # [TILE_B, IN_P]   bf16  (per-step tile)
    w1_ref, b1_ref,            # [IN_P, H_P] bf16, [1, H_P] f32   (resident)
    w2_ref, b2_ref,            # [H_P, H_P]  bf16, [1, H_P] f32
    w3_ref, b3_ref,
    w4_ref, b4_ref,
    wh_ref, bh_ref,            # fused heads: [H_P, HEAD_P] bf16, [1, HEAD_P] f32
    lo_ref, hi_ref,            # per-column clamp bounds: [1, HEAD_P] f32
    out_ref,                   # [TILE_B, HEAD_P] f32  (mean | log_std | zero-pad)
):
    def layer(x_bf16, w_ref, b_ref):
        # bf16 MXU matmul with f32 accumulation; bias add + ReLU in f32 (VPU, v5e-safe).
        h = jnp.dot(x_bf16, w_ref[...], preferred_element_type=jnp.float32)
        h = jnp.maximum(h + b_ref[...], 0.0)
        return h.astype(jnp.bfloat16)

    x = state_ref[...]
    x = layer(x, w1_ref, b1_ref)
    x = layer(x, w2_ref, b2_ref)
    x = layer(x, w3_ref, b3_ref)
    x = layer(x, w4_ref, b4_ref)

    # Fused mean / log_std head: one wide matmul, one lane-dense store.
    y = jnp.dot(x, wh_ref[...], preferred_element_type=jnp.float32) + bh_ref[...]
    # Per-column clamp: [-inf, +inf] for mean & zero-padded columns (clip(0) == 0 exactly),
    # [LOG_STD_MIN, LOG_STD_MAX] for the log_std columns.
    y = jnp.clip(y, lo_ref[...], hi_ref[...])
    out_ref[...] = y.astype(out_ref.dtype)


def prepare_params(params, log_std_min=LOG_STD_MIN, log_std_max=LOG_STD_MAX):
    """One-shot: pad feature dims to multiples of 128, cast weights to bf16, fuse the two
    heads, and build the per-column clamp-bound rows. Call once, reuse across forwards."""
    num_inputs, H = params["w1"].shape
    A = params["wm"].shape[1]
    IN_P = _round_up(num_inputs, 128)
    H_P = _round_up(H, 128)
    HEAD_P = _round_up(2 * A, 128)

    def pad2(x, rows, cols):
        return jnp.pad(x, ((0, rows - x.shape[0]), (0, cols - x.shape[1])))

    wh = jnp.concatenate([params["wm"], params["ws"]], axis=1)
    bh = jnp.concatenate([params["bm"], params["bs"]], axis=1)

    col = jnp.arange(HEAD_P)
    is_log_std = (col >= A) & (col < 2 * A)
    lo = jnp.where(is_log_std, log_std_min, -jnp.inf).astype(jnp.float32)[None, :]
    hi = jnp.where(is_log_std, log_std_max, jnp.inf).astype(jnp.float32)[None, :]

    return dict(
        w1=pad2(params["w1"], IN_P, H_P).astype(jnp.bfloat16),
        b1=pad2(params["b1"], 1, H_P).astype(jnp.float32),
        w2=pad2(params["w2"], H_P, H_P).astype(jnp.bfloat16),
        b2=pad2(params["b2"], 1, H_P).astype(jnp.float32),
        w3=pad2(params["w3"], H_P, H_P).astype(jnp.bfloat16),
        b3=pad2(params["b3"], 1, H_P).astype(jnp.float32),
        w4=pad2(params["w4"], H_P, H_P).astype(jnp.bfloat16),
        b4=pad2(params["b4"], 1, H_P).astype(jnp.float32),
        wh=pad2(wh, H_P, HEAD_P).astype(jnp.bfloat16),
        bh=pad2(bh, 1, HEAD_P).astype(jnp.float32),
        lo=lo, hi=hi,
    )


@functools.partial(jax.jit, static_argnames=("num_actions", "tile_b"))
def policy_forward(state, prepped, *, num_actions, tile_b=None):
    """state: [B, num_inputs] float32. prepped: output of prepare_params (pre-padded)."""
    B, num_inputs = state.shape
    IN_P, H_P = prepped["w1"].shape
    HEAD_P = prepped["wh"].shape[1]
    A = num_actions

    if tile_b is None:
        tile_b = _default_tile_b()
    TILE_B, B_P = _choose_tile_b(B, tile_b)
    grid = (B_P // TILE_B,)

    # Only the (small) state is padded/cast per call; weights were prepared once.
    state_p = jnp.pad(state, ((0, B_P - B), (0, IN_P - num_inputs))).astype(jnp.bfloat16)

    # Advisory cost estimate for XLA's scheduler.
    flops = 2 * B_P * (IN_P * H_P + 3 * H_P * H_P + H_P * HEAD_P)
    bytes_accessed = (
        B_P * IN_P * 2                                      # state (bf16)
        + (IN_P * H_P + 3 * H_P * H_P + H_P * HEAD_P) * 2   # weights (bf16, loaded once)
        + (4 * H_P + 3 * HEAD_P) * 4                        # biases + clamp rows (f32)
        + B_P * HEAD_P * 4                                   # fused output (f32)
    )

    out = pl.pallas_call(
        _policy_kernel,
        out_shape=jax.ShapeDtypeStruct((B_P, HEAD_P), jnp.float32),
        grid=grid,
        in_specs=[
            pl.BlockSpec((TILE_B, IN_P), lambda i: (i, 0)),   # state tile (double-buffered)
            _resident_spec((IN_P, H_P)), _resident_spec((1, H_P)),
            _resident_spec((H_P, H_P)), _resident_spec((1, H_P)),
            _resident_spec((H_P, H_P)), _resident_spec((1, H_P)),
            _resident_spec((H_P, H_P)), _resident_spec((1, H_P)),
            _resident_spec((H_P, HEAD_P)), _resident_spec((1, HEAD_P)),
            _resident_spec((1, HEAD_P)), _resident_spec((1, HEAD_P)),
        ],
        out_specs=pl.BlockSpec((TILE_B, HEAD_P), lambda i: (i, 0)),
        compiler_params=pltpu.CompilerParams(
            dimension_semantics=("parallel",),
            vmem_limit_bytes=_vmem_limit_bytes(),
        ),
        cost_estimate=pl.CostEstimate(
            flops=flops, transcendentals=0, bytes_accessed=bytes_accessed),
    )(state_p,
      prepped["w1"], prepped["b1"], prepped["w2"], prepped["b2"],
      prepped["w3"], prepped["b3"], prepped["w4"], prepped["b4"],
      prepped["wh"], prepped["bh"], prepped["lo"], prepped["hi"])
    # TODO(synk): for hidden >= ~2048 on v7x (64 MiB/TC) the three HxH resident weights no
    # longer fit even single-buffered; stream them from HBM (memory_space=pl.ANY +
    # pltpu.emit_pipeline over K-chunks) or split the MLP across two pallas_calls.

    mean = out[:B, :A]
    log_std = out[:B, A:2 * A]
    return mean, log_std


def init_params(key, num_inputs, num_actions, hidden_size, init_w=0.003):
    """Deterministic synthetic init mirroring the PyTorch module's shapes.
    Weights are stored transposed: [in_features, out_features]."""
    keys = jax.random.split(key, 12)

    def linear_init(kw, kb, fan_in, fan_out):
        bound = 1.0 / jnp.sqrt(jnp.asarray(fan_in, jnp.float32))
        w = jax.random.uniform(kw, (fan_in, fan_out), jnp.float32, -bound, bound)
        b = jax.random.uniform(kb, (1, fan_out), jnp.float32, -bound, bound)
        return w, b

    def head_init(kw, kb, fan_in, fan_out):
        w = jax.random.uniform(kw, (fan_in, fan_out), jnp.float32, -init_w, init_w)
        b = jax.random.uniform(kb, (1, fan_out), jnp.float32, -init_w, init_w)
        return w, b

    w1, b1 = linear_init(keys[0], keys[1], num_inputs, hidden_size)
    w2, b2 = linear_init(keys[2], keys[3], hidden_size, hidden_size)
    w3, b3 = linear_init(keys[4], keys[5], hidden_size, hidden_size)
    w4, b4 = linear_init(keys[6], keys[7], hidden_size, hidden_size)
    wm, bm = head_init(keys[8], keys[9], hidden_size, num_actions)
    ws, bs = head_init(keys[10], keys[11], hidden_size, num_actions)

    return dict(w1=w1, b1=b1, w2=w2, b2=b2, w3=w3, b3=b3, w4=w4, b4=b4,
                wm=wm, bm=bm, ws=ws, bs=bs)


def reference_forward(state, params):
    x = jax.nn.relu(state @ params["w1"] + params["b1"])
    x = jax.nn.relu(x @ params["w2"] + params["b2"])
    x = jax.nn.relu(x @ params["w3"] + params["b3"])
    x = jax.nn.relu(x @ params["w4"] + params["b4"])
    mean = x @ params["wm"] + params["bm"]
    log_std = jnp.clip(x @ params["ws"] + params["bs"], LOG_STD_MIN, LOG_STD_MAX)
    return mean, log_std


if __name__ == "__main__":
    num_inputs, num_actions, hidden_size = 16, 4, 32

    key = jax.random.PRNGKey(0)
    k_params, k_state_a, k_state_b = jax.random.split(key, 3)

    params = init_params(k_params, num_inputs, num_actions, hidden_size)
    prepped = prepare_params(params)   # one-shot pad + bf16 cast; reused across calls

    # Case 1: tiny batch (grid = 1 step).
    state_a = jax.random.normal(k_state_a, (2, num_inputs), jnp.float32)
    mean_a, log_std_a = policy_forward(state_a, prepped, num_actions=num_actions)
    # Case 2: awkward batch exercising multi-step grid + resident-weight reuse.
    state_b = jax.random.normal(k_state_b, (40, num_inputs), jnp.float32)
    mean_b, log_std_b = policy_forward(state_b, prepped, num_actions=num_actions)
    jax.block_until_ready((mean_a, log_std_a, mean_b, log_std_b))

    # Correctness vs. pure-JAX f32 reference (kernel uses bf16 weights on the MXU with
    # f32 accumulation, so tolerances are loosened accordingly).
    for state, mean, log_std in ((state_a, mean_a, log_std_a), (state_b, mean_b, log_std_b)):
        mean_ref, log_std_ref = reference_forward(state, params)
        assert mean.shape == (state.shape[0], num_actions)
        assert log_std.shape == (state.shape[0], num_actions)
        assert jnp.allclose(mean, mean_ref, atol=3e-2, rtol=3e-2)
        assert jnp.allclose(log_std, log_std_ref, atol=3e-2, rtol=3e-2)
        assert bool(jnp.all(log_std <= LOG_STD_MAX)) and bool(jnp.all(log_std >= LOG_STD_MIN))

    print("KERNEL_OK")
</pallas_src>

<mosaic_0001>
module attributes {stable_mosaic.version = 11 : i64} {
  func.func @_policy_kernel(%arg0: i32, %arg1: memref<16x128xbf16, #tpu.memory_space<vmem>>, %arg2: memref<128x128xbf16, #tpu.memory_space<vmem>>, %arg3: memref<1x128xf32, #tpu.memory_space<vmem>>, %arg4: memref<128x128xbf16, #tpu.memory_space<vmem>>, %arg5: memref<1x128xf32, #tpu.memory_space<vmem>>, %arg6: memref<128x128xbf16, #tpu.memory_space<vmem>>, %arg7: memref<1x128xf32, #tpu.memory_space<vmem>>, %arg8: memref<128x128xbf16, #tpu.memory_space<vmem>>, %arg9: memref<1x128xf32, #tpu.memory_space<vmem>>, %arg10: memref<128x128xbf16, #tpu.memory_space<vmem>>, %arg11: memref<1x128xf32, #tpu.memory_space<vmem>>, %arg12: memref<1x128xf32, #tpu.memory_space<vmem>>, %arg13: memref<1x128xf32, #tpu.memory_space<vmem>>, %arg14: memref<16x128xf32, #tpu.memory_space<vmem>>) attributes {dimension_semantics = [#tpu.dimension_semantics<parallel>], iteration_bounds = array<i64: 1>, scalar_prefetch = 0 : i64, scratch_operands = 0 : i64, tpu.core_type = #tpu.core_type<tc>, window_params = [{transform_indices = @transform_0, window_bounds = array<i64: 16, 128>}, {pipeline_mode = #tpu.pipeline_mode<synchronous>, transform_indices = @transform_1, window_bounds = array<i64: 128, 128>}, {pipeline_mode = #tpu.pipeline_mode<synchronous>, transform_indices = @transform_2, window_bounds = array<i64: 1, 128>}, {pipeline_mode = #tpu.pipeline_mode<synchronous>, transform_indices = @transform_3, window_bounds = array<i64: 128, 128>}, {pipeline_mode = #tpu.pipeline_mode<synchronous>, transform_indices = @transform_4, window_bounds = array<i64: 1, 128>}, {pipeline_mode = #tpu.pipeline_mode<synchronous>, transform_indices = @transform_5, window_bounds = array<i64: 128, 128>}, {pipeline_mode = #tpu.pipeline_mode<synchronous>, transform_indices = @transform_6, window_bounds = array<i64: 1, 128>}, {pipeline_mode = #tpu.pipeline_mode<synchronous>, transform_indices = @transform_7, window_bounds = array<i64: 128, 128>}, {pipeline_mode = #tpu.pipeline_mode<synchronous>, transform_indices = @transform_8, window_bounds = array<i64: 1, 128>}, {pipeline_mode = #tpu.pipeline_mode<synchronous>, transform_indices = @transform_9, window_bounds = array<i64: 128, 128>}, {pipeline_mode = #tpu.pipeline_mode<synchronous>, transform_indices = @transform_10, window_bounds = array<i64: 1, 128>}, {pipeline_mode = #tpu.pipeline_mode<synchronous>, transform_indices = @transform_11, window_bounds = array<i64: 1, 128>}, {pipeline_mode = #tpu.pipeline_mode<synchronous>, transform_indices = @transform_12, window_bounds = array<i64: 1, 128>}, {transform_indices = @transform_13, window_bounds = array<i64: 16, 128>}]} {
    %c0 = arith.constant 0 : index
    %c0_0 = arith.constant 0 : index
    %0 = vector.load %arg1[%c0, %c0_0] : memref<16x128xbf16, #tpu.memory_space<vmem>>, vector<16x128xbf16>
    %c0_1 = arith.constant 0 : index
    %c0_2 = arith.constant 0 : index
    %1 = vector.load %arg2[%c0_1, %c0_2] : memref<128x128xbf16, #tpu.memory_space<vmem>>, vector<128x128xbf16>
    %cst = arith.constant dense<0.000000e+00> : vector<16x128xf32>
    %2 = tpu.matmul %0, %1, %cst {dimension_numbers = #tpu.dot_dimension_numbers<[1], [0], [0], [1], [0, 0, 1, 1], [], []>} : vector<16x128xbf16>, vector<128x128xbf16>, vector<16x128xf32> -> vector<16x128xf32>
    %c0_3 = arith.constant 0 : index
    %c0_4 = arith.constant 0 : index
    %3 = vector.load %arg3[%c0_3, %c0_4] : memref<1x128xf32, #tpu.memory_space<vmem>>, vector<1x128xf32>
    %4 = vector.broadcast %3 : vector<1x128xf32> to vector<16x128xf32>
    %5 = arith.addf %2, %4 : vector<16x128xf32>
    %cst_5 = arith.constant 0.000000e+00 : f32
    %6 = vector.broadcast %cst_5 : f32 to vector<16x128xf32>
    %7 = arith.maximumf %5, %6 : vector<16x128xf32>
    %8 = arith.truncf %7 : vector<16x128xf32> to vector<16x128xbf16>
    %c0_6 = arith.constant 0 : index
    %c0_7 = arith.constant 0 : index
    %9 = vector.load %arg4[%c0_6, %c0_7] : memref<128x128xbf16, #tpu.memory_space<vmem>>, vector<128x128xbf16>
    %cst_8 = arith.constant dense<0.000000e+00> : vector<16x128xf32>
    %10 = tpu.matmul %8, %9, %cst_8 {dimension_numbers = #tpu.dot_dimension_numbers<[1], [0], [0], [1], [0, 0, 1, 1], [], []>} : vector<16x128xbf16>, vector<128x128xbf16>, vector<16x128xf32> -> vector<16x128xf32>
    %c0_9 = arith.constant 0 : index
    %c0_10 = arith.constant 0 : index
    %11 = vector.load %arg5[%c0_9, %c0_10] : memref<1x128xf32, #tpu.memory_space<vmem>>, vector<1x128xf32>
    %12 = vector.broadcast %11 : vector<1x128xf32> to vector<16x128xf32>
    %13 = arith.addf %10, %12 : vector<16x128xf32>
    %cst_11 = arith.constant 0.000000e+00 : f32
    %14 = vector.broadcast %cst_11 : f32 to vector<16x128xf32>
    %15 = arith.maximumf %13, %14 : vector<16x128xf32>
    %16 = arith.truncf %15 : vector<16x128xf32> to vector<16x128xbf16>
    %c0_12 = arith.constant 0 : index
    %c0_13 = arith.constant 0 : index
    %17 = vector.load %arg6[%c0_12, %c0_13] : memref<128x128xbf16, #tpu.memory_space<vmem>>, vector<128x128xbf16>
    %cst_14 = arith.constant dense<0.000000e+00> : vector<16x128xf32>
    %18 = tpu.matmul %16, %17, %cst_14 {dimension_numbers = #tpu.dot_dimension_numbers<[1], [0], [0], [1], [0, 0, 1, 1], [], []>} : vector<16x128xbf16>, vector<128x128xbf16>, vector<16x128xf32> -> vector<16x128xf32>
    %c0_15 = arith.constant 0 : index
    %c0_16 = arith.constant 0 : index
    %19 = vector.load %arg7[%c0_15, %c0_16] : memref<1x128xf32, #tpu.memory_space<vmem>>, vector<1x128xf32>
    %20 = vector.broadcast %19 : vector<1x128xf32> to vector<16x128xf32>
    %21 = arith.addf %18, %20 : vector<16x128xf32>
    %cst_17 = arith.constant 0.000000e+00 : f32
    %22 = vector.broadcast %cst_17 : f32 to vector<16x128xf32>
    %23 = arith.maximumf %21, %22 : vector<16x128xf32>
    %24 = arith.truncf %23 : vector<16x128xf32> to vector<16x128xbf16>
    %c0_18 = arith.constant 0 : index
    %c0_19 = arith.constant 0 : index
    %25 = vector.load %arg8[%c0_18, %c0_19] : memref<128x128xbf16, #tpu.memory_space<vmem>>, vector<128x128xbf16>
    %cst_20 = arith.constant dense<0.000000e+00> : vector<16x128xf32>
    %26 = tpu.matmul %24, %25, %cst_20 {dimension_numbers = #tpu.dot_dimension_numbers<[1], [0], [0], [1], [0, 0, 1, 1], [], []>} : vector<16x128xbf16>, vector<128x128xbf16>, vector<16x128xf32> -> vector<16x128xf32>
    %c0_21 = arith.constant 0 : index
    %c0_22 = arith.constant 0 : index
    %27 = vector.load %arg9[%c0_21, %c0_22] : memref<1x128xf32, #tpu.memory_space<vmem>>, vector<1x128xf32>
    %28 = vector.broadcast %27 : vector<1x128xf32> to vector<16x128xf32>
    %29 = arith.addf %26, %28 : vector<16x128xf32>
    %cst_23 = arith.constant 0.000000e+00 : f32
    %30 = vector.broadcast %cst_23 : f32 to vector<16x128xf32>
    %31 = arith.maximumf %29, %30 : vector<16x128xf32>
    %32 = arith.truncf %31 : vector<16x128xf32> to vector<16x128xbf16>
    %c0_24 = arith.constant 0 : index
    %c0_25 = arith.constant 0 : index
    %33 = vector.load %arg10[%c0_24, %c0_25] : memref<128x128xbf16, #tpu.memory_space<vmem>>, vector<128x128xbf16>
    %cst_26 = arith.constant dense<0.000000e+00> : vector<16x128xf32>
    %34 = tpu.matmul %32, %33, %cst_26 {dimension_numbers = #tpu.dot_dimension_numbers<[1], [0], [0], [1], [0, 0, 1, 1], [], []>} : vector<16x128xbf16>, vector<128x128xbf16>, vector<16x128xf32> -> vector<16x128xf32>
    %c0_27 = arith.constant 0 : index
    %c0_28 = arith.constant 0 : index
    %35 = vector.load %arg11[%c0_27, %c0_28] : memref<1x128xf32, #tpu.memory_space<vmem>>, vector<1x128xf32>
    %36 = vector.broadcast %35 : vector<1x128xf32> to vector<16x128xf32>
    %37 = arith.addf %34, %36 : vector<16x128xf32>
    %c0_29 = arith.constant 0 : index
    %c0_30 = arith.constant 0 : index
    %38 = vector.load %arg12[%c0_29, %c0_30] : memref<1x128xf32, #tpu.memory_space<vmem>>, vector<1x128xf32>
    %c0_31 = arith.constant 0 : index
    %c0_32 = arith.constant 0 : index
    %39 = vector.load %arg13[%c0_31, %c0_32] : memref<1x128xf32, #tpu.memory_space<vmem>>, vector<1x128xf32>
    %40 = vector.broadcast %38 : vector<1x128xf32> to vector<16x128xf32>
    %41 = arith.maximumf %40, %37 : vector<16x128xf32>
    %42 = vector.broadcast %39 : vector<1x128xf32> to vector<16x128xf32>
    %43 = arith.minimumf %42, %41 : vector<16x128xf32>
    %c0_33 = arith.constant 0 : index
    %c0_34 = arith.constant 0 : index
    %44 = vector.load %arg14[%c0_33, %c0_34] : memref<16x128xf32, #tpu.memory_space<vmem>>, vector<16x128xf32>
    tpu.vector_store %arg14[%c0_33, %c0_34], %43 {strides = array<i32>} : memref<16x128xf32, #tpu.memory_space<vmem>>, vector<16x128xf32>,
    return
  }
  func.func @transform_0(%arg0: i32) -> (i32, i32) {
    %c0_i32 = arith.constant 0 : i32
    %c0_i32_0 = arith.constant 0 : i32
    return %arg0, %c0_i32 : i32, i32
  }
  func.func @transform_1(%arg0: i32) -> (i32, i32) {
    %c0_i32 = arith.constant 0 : i32
    %c0_i32_0 = arith.constant 0 : i32
    %c0_i32_1 = arith.constant 0 : i32
    return %c0_i32, %c0_i32_0 : i32, i32
  }
  func.func @transform_2(%arg0: i32) -> (i32, i32) {
    %c0_i32 = arith.constant 0 : i32
    %c0_i32_0 = arith.constant 0 : i32
    %c0_i32_1 = arith.constant 0 : i32
    return %c0_i32, %c0_i32_0 : i32, i32
  }
  func.func @transform_3(%arg0: i32) -> (i32, i32) {
    %c0_i32 = arith.constant 0 : i32
    %c0_i32_0 = arith.constant 0 : i32
    %c0_i32_1 = arith.constant 0 : i32
    return %c0_i32, %c0_i32_0 : i32, i32
  }
  func.func @transform_4(%arg0: i32) -> (i32, i32) {
    %c0_i32 = arith.constant 0 : i32
    %c0_i32_0 = arith.constant 0 : i32
    %c0_i32_1 = arith.constant 0 : i32
    return %c0_i32, %c0_i32_0 : i32, i32
  }
  func.func @transform_5(%arg0: i32) -> (i32, i32) {
    %c0_i32 = arith.constant 0 : i32
    %c0_i32_0 = arith.constant 0 : i32
    %c0_i32_1 = arith.constant 0 : i32
    return %c0_i32, %c0_i32_0 : i32, i32
  }
  func.func @transform_6(%arg0: i32) -> (i32, i32) {
    %c0_i32 = arith.constant 0 : i32
    %c0_i32_0 = arith.constant 0 : i32
    %c0_i32_1 = arith.constant 0 : i32
    return %c0_i32, %c0_i32_0 : i32, i32
  }
  func.func @transform_7(%arg0: i32) -> (i32, i32) {
    %c0_i32 = arith.constant 0 : i32
    %c0_i32_0 = arith.constant 0 : i32
    %c0_i32_1 = arith.constant 0 : i32
    return %c0_i32, %c0_i32_0 : i32, i32
  }
  func.func @transform_8(%arg0: i32) -> (i32, i32) {
    %c0_i32 = arith.constant 0 : i32
    %c0_i32_0 = arith.constant 0 : i32
    %c0_i32_1 = arith.constant 0 : i32
    return %c0_i32, %c0_i32_0 : i32, i32
  }
  func.func @transform_9(%arg0: i32) -> (i32, i32) {
    %c0_i32 = arith.constant 0 : i32
    %c0_i32_0 = arith.constant 0 : i32
    %c0_i32_1 = arith.constant 0 : i32
    return %c0_i32, %c0_i32_0 : i32, i32
  }
  func.func @transform_10(%arg0: i32) -> (i32, i32) {
    %c0_i32 = arith.constant 0 : i32
    %c0_i32_0 = arith.constant 0 : i32
    %c0_i32_1 = arith.constant 0 : i32
    return %c0_i32, %c0_i32_0 : i32, i32
  }
  func.func @transform_11(%arg0: i32) -> (i32, i32) {
    %c0_i32 = arith.constant 0 : i32
    %c0_i32_0 = arith.constant 0 : i32
    %c0_i32_1 = arith.constant 0 : i32
    return %c0_i32, %c0_i32_0 : i32, i32
  }
  func.func @transform_12(%arg0: i32) -> (i32, i32) {
    %c0_i32 = arith.constant 0 : i32
    %c0_i32_0 = arith.constant 0 : i32
    %c0_i32_1 = arith.constant 0 : i32
    return %c0_i32, %c0_i32_0 : i32, i32
  }
  func.func @transform_13(%arg0: i32) -> (i32, i32) {
    %c0_i32 = arith.constant 0 : i32
    %c0_i32_0 = arith.constant 0 : i32
    return %arg0, %c0_i32 : i32, i32
  }
}

</mosaic_0001>

<bundles_post_ra>
// kernel: policy_forward.1
= control target key start
LH: loop header
LB: loop body
LE: loop exit
PB: predicated region body
PF: predicated region fallthrough
CT: control target
= control target key end

     0   :  { %18 = vsyncpa [#allocation3], 0  ;;  %s1040_s0 = inlined_call_operand.vmem [shape: bf16[16,128], index: 0, kind: input, shape index: {}]   ;;  %s1041_s1 = inlined_call_operand.hbm [shape: bf16[128,128], index: 1, kind: input, shape index: {}]   ;;  %s1042_s2 = inlined_call_operand.vmem [shape: f32[1,128], index: 2, kind: input, shape index: {}]   ;;  %s1043_s3 = inlined_call_operand.hbm [shape: bf16[128,128], index: 3, kind: input, shape index: {}]   ;;  %s1044_s4 = inlined_call_operand.vmem [shape: f32[1,128], index: 4, kind: input, shape index: {}]   ;;  %s1045_s5 = inlined_call_operand.hbm [shape: bf16[128,128], index: 5, kind: input, shape index: {}]   ;;  %s1046_s6 = inlined_call_operand.vmem [shape: f32[1,128], index: 6, kind: input, shape index: {}]   ;;  %s1047_s7 = inlined_call_operand.hbm [shape: bf16[128,128], index: 7, kind: input, shape index: {}]   ;;  %s1048_s8 = inlined_call_operand.vmem [shape: f32[1,128], index: 8, kind: input, shape index: {}]   ;;  %s1049_s9 = inlined_call_operand.hbm [shape: bf16[128,128], index: 9, kind: input, shape index: {}]   ;;  %s1050_s10 = inlined_call_operand.vmem [shape: f32[1,128], index: 10, kind: input, shape index: {}]   ;;  %s1051_s11 = inlined_call_operand.vmem [shape: f32[1,128], index: 11, kind: input, shape index: {}]   ;;  %s1052_s12 = inlined_call_operand.vmem [shape: f32[1,128], index: 12, kind: input, shape index: {}]   ;;  %s1053_s13 = inlined_call_operand.vmem [shape: f32[16,128], index: 13, kind: output, shape index: {}]  }
   0x1   :  { %19 = vsyncpa [#allocation5], 0 }
   0x2   :  { %20 = vsyncpa [#allocation8], 0  ;;  %s42_s27 = sshll.u32 %s1043_s3, 4  ;;  %s918_s28 = smov [#allocation4]   ;;  %s43_s27 = int_to_ptr.hbm [resolvable:$true] %s42_s27 }
   0x3   :  { %s44_s29 = sshll.u32 %s918_s28, 4  ;;  %s72_s15 = sshll.u32 %s1047_s7, 4  ;;  %s45_s29 = int_to_ptr.vmem [resolvable:$true] %s44_s29  ;;  %s73_s15 = int_to_ptr.hbm [resolvable:$true] %s72_s15 }
   0x4   :  { %s919_s16 = smov 64   ;;  %s920_s17 = smov 4  }
   0x5   :  { %50 = dma.hbm_to_vmem [thread:$0]  %s43_s27, 1024, %s45_s29, [#allocation5], %s919_s16, %s919_s16, %s920_s17  }
   0x6   :  { %s921_s18 = smov [#allocation7]   ;;  %s27_s22 = sshll.u32 %s1041_s1, 4  ;;  %s28_s22 = int_to_ptr.hbm [resolvable:$true] %s27_s22 }
   0x7   :  { %s74_s19 = sshll.u32 %s921_s18, 4  ;;  %s57_s24 = sshll.u32 %s1045_s5, 4  ;;  %s75_s19 = int_to_ptr.vmem [resolvable:$true] %s74_s19  ;;  %s58_s24 = int_to_ptr.hbm [resolvable:$true] %s57_s24 }
   0x8   :  { %80 = dma.hbm_to_vmem [thread:$0]  %s73_s15, 1024, %s75_s19, [#allocation8], %s919_s16, %s919_s16, %s920_s17  }
   0x9   :  { %s922_s25 = smov [#allocation2]   ;;  %s923_s7 = smov [#allocation6]  }
   0xa   :  { %s29_s26 = sshll.u32 %s922_s25, 4  ;;  %s59_s27 = sshll.u32 %s923_s7, 4  ;;  %s30_s26 = int_to_ptr.vmem [resolvable:$true] %s29_s26  ;;  %s60_s27 = int_to_ptr.vmem [resolvable:$true] %s59_s27 }
   0xb   :  { %35 = dma.hbm_to_vmem [thread:$0]  %s28_s22, 1024, %s30_s26, [#allocation3], %s919_s16, %s919_s16, %s920_s17  }
   0xc   :  { %s87_s30 = sshll.u32 %s1049_s9, 4  ;;  %s924_s1 = smov [#allocation9]   ;;  %s88_s30 = int_to_ptr.hbm [resolvable:$true] %s87_s30 }
   0xd   :  { %65 = dma.hbm_to_vmem [thread:$0]  %s58_s24, 1024, %s60_s27, [#allocation5], %s919_s16, %s919_s16, %s920_s17  }
   0xe   :  { %s89_s14 = sshll.u32 %s924_s1, 4  ;;  %s90_s14 = int_to_ptr.vmem [resolvable:$true] %s89_s14 }
   0xf   :  { %95 = dma.hbm_to_vmem [thread:$0]  %s88_s30, 1024, %s90_s14, [#allocation8], %s919_s16, %s919_s16, %s920_s17  }
  0x10   :  { %912 = dma.done.wait [#allocation3], 1024  }
  0x11   :  { %913 = vsyncadd [#allocation3], 4294966272 }
  0x12   :  { %914 = dma.done.wait [#allocation5], 2048  }
  0x13   :  { %915 = vsyncadd [#allocation5], 4294965248 }
  0x14   :  { %916 = dma.done.wait [#allocation8], 2048  }
  0x15   :  { %917 = vsyncadd [#allocation8], 4294965248  ;;  %v745_v0 = vld [vmem:[#allocation2 + $0x38] sm:$0xff]  ;;  %v744_v1 = vld [vmem:[#allocation2 + $0x30] sm:$0xff] }
  0x16   :  { %198 = vmatpush.bf16.msra.mxu0 %v745_v0  ;;  %v753_v2 = vld [vmem:[#allocation4 + $0x38] sm:$0xff]  ;;  %v743_v3 = vld [vmem:[#allocation2 + $0x28] sm:$0xff]  ;;  %v752_v4 = vld [vmem:[#allocation4 + $0x30] sm:$0xff] }
  0x17   :  { %283 = vmatpush.bf16.msra.mxu1 %v753_v2  ;;  %v751_v5 = vld [vmem:[#allocation4 + $0x28] sm:$0xff]  ;;  %v742_v6 = vld [vmem:[#allocation2 + $0x20] sm:$0xff]  ;;  %v741_v8 = vld [vmem:[#allocation2 + $0x18] sm:$0xff] }
  0x18   :  { %v750_v7 = vld [vmem:[#allocation4 + $0x20] sm:$0xff]  ;;  %v740_v9 = vld [vmem:[#allocation2 + $0x10] sm:$0xff]  ;;  %v739_v10 = vld [vmem:[#allocation2 + $0x8] sm:$0xff] }
  0x19   :  { %v738_v11 = vld [vmem:[#allocation2] sm:$0xff]  ;;  %v749_v13 = vld [vmem:[#allocation4 + $0x18] sm:$0xff]  ;;  %v748_v14 = vld [vmem:[#allocation4 + $0x10] sm:$0xff] }
  0x1a   :  { %199 = vmatpush.bf16.msra.mxu0 %v744_v1  ;;  %v737_v12 = vld [vmem:[%s1040_s0] sm:$0xff]  ;;  %v747_v15 = vld [vmem:[#allocation4 + $0x8] sm:$0xff]  ;;  %v761_v17 = vld [vmem:[#allocation6 + $0x38] sm:$0xff] }
  0x1b   :  { %284 = vmatpush.bf16.msra.mxu1 %v752_v4  ;;  %v746_v16 = vld [vmem:[#allocation4] sm:$0xff]  ;;  %368 = vmatpush.bf16.msra.mxu2 %v761_v17  ;;  %v760_v18 = vld [vmem:[#allocation6 + $0x30] sm:$0xff]  ;;  %v759_v19 = vld [vmem:[#allocation6 + $0x28] sm:$0xff] }
  0x1c   :  { %v758_v20 = vld [vmem:[#allocation6 + $0x20] sm:$0xff]  ;;  %v757_v29 = vld [vmem:[#allocation6 + $0x18] sm:$0xff]  ;;  %v756_v30 = vld [vmem:[#allocation6 + $0x10] sm:$0xff] }
  0x1d   :  { %v785_v22 = vld [vmem:[%s1042_s2] ss:$0 sm:$0xff]  ;;  %v755_v31 = vld [vmem:[#allocation6 + $0x8] sm:$0xff]  ;;  %v769_v33 = vld [vmem:[#allocation7 + $0x38] sm:$0xff] }
  0x1e   :  { %200 = vmatpush.bf16.msra.mxu0 %v743_v3  ;;  %v754_v32 = vld [vmem:[#allocation6] sm:$0xff]  ;;  %453 = vmatpush.bf16.msra.mxu3 %v769_v33  ;;  %v768_v34 = vld [vmem:[#allocation7 + $0x30] sm:$0xff]  ;;  %v767_v35 = vld [vmem:[#allocation7 + $0x28] sm:$0xff] }
  0x1f   :  { %285 = vmatpush.bf16.msra.mxu1 %v751_v5  ;;  %369 = vmatpush.bf16.msra.mxu2 %v760_v18  ;;  %v766_v36 = vld [vmem:[#allocation7 + $0x20] sm:$0xff]  ;;  %v765_v45 = vld [vmem:[#allocation7 + $0x18] sm:$0xff]  ;;  %v764_v46 = vld [vmem:[#allocation7 + $0x10] sm:$0xff] }
  0x20   :  { %v786_v38 = vld [vmem:[%s1044_s4] ss:$0 sm:$0xff]  ;;  %v763_v47 = vld [vmem:[#allocation7 + $0x8] sm:$0xff]  ;;  %v777_v49 = vld [vmem:[#allocation9 + $0x38] sm:$0xff] }
  0x21   :  { %v762_v48 = vld [vmem:[#allocation7] sm:$0xff]  ;;  %v776_v50 = vld [vmem:[#allocation9 + $0x30] sm:$0xff]  ;;  %v775_v51 = vld [vmem:[#allocation9 + $0x28] sm:$0xff] }
  0x22   :  { %201 = vmatpush.bf16.msra.mxu0 %v742_v6  ;;  %454 = vmatpush.bf16.msra.mxu3 %v768_v34  ;;  %v774_v52 = vld [vmem:[#allocation9 + $0x20] sm:$0xff]  ;;  %v773_v61 = vld [vmem:[#allocation9 + $0x18] sm:$0xff]  ;;  %v772_v62 = vld [vmem:[#allocation9 + $0x10] sm:$0xff] }
  0x23   :  { %286 = vmatpush.bf16.msra.mxu1 %v750_v7  ;;  %370 = vmatpush.bf16.msra.mxu2 %v759_v19  ;;  %v787_v54 = vld [vmem:[%s1046_s6] ss:$0 sm:$0xff]  ;;  %v771_v63 = vld [vmem:[#allocation9 + $0x8] sm:$0xff] }
  0x24   :  { %v770_v0 = vld [vmem:[#allocation9] sm:$0xff] }
  0x25   :  { %v788_v2 = vld [vmem:[%s1048_s8] ss:$0 sm:$0xff] }
  0x26   :  { %202 = vmatpush.bf16.msra.mxu0 %v741_v8  ;;  %455 = vmatpush.bf16.msra.mxu3 %v767_v35 }
  0x27   :  { %287 = vmatpush.bf16.msra.mxu1 %v749_v13  ;;  %371 = vmatpush.bf16.msra.mxu2 %v758_v20  ;;  %v791_v13 = vld [vmem:[%s1052_s12] ss:$0 sm:$0xff] }
  0x2a   :  { %203 = vmatpush.bf16.msra.mxu0 %v740_v9  ;;  %456 = vmatpush.bf16.msra.mxu3 %v766_v36  ;;  %v789_v9 = vld [vmem:[%s1050_s10] ss:$0 sm:$0xff] }
  0x2b   :  { %288 = vmatpush.bf16.msra.mxu1 %v748_v14  ;;  %372 = vmatpush.bf16.msra.mxu2 %v757_v29 }
  0x2e   :  { %204 = vmatpush.bf16.msra.mxu0 %v739_v10  ;;  %457 = vmatpush.bf16.msra.mxu3 %v765_v45  ;;  %v790_v10 = vld [vmem:[%s1051_s11] ss:$0 sm:$0xff] }
  0x2f   :  { %289 = vmatpush.bf16.msra.mxu1 %v747_v15  ;;  %373 = vmatpush.bf16.msra.mxu2 %v756_v30 }
  0x32   :  { %205 = vmatpush.bf16.msra.mxu0 %v738_v11  ;;  %458 = vmatpush.bf16.msra.mxu3 %v764_v46 }
  0x33   :  { %290 = vmatpush.bf16.msra.mxu1 %v746_v16  ;;  %374 = vmatpush.bf16.msra.mxu2 %v755_v31 }
  0x35   :  { %206 = vmatmul.bf16.vlgmr.msra.gmra.mxu0 %v737_v12 }
  0x36   :  { %459 = vmatpush.bf16.msra.mxu3 %v763_v47  ;;  %538 = vmatpush.bf16.msrb.mxu0 %v777_v49 }
  0x37   :  { %375 = vmatpush.bf16.msra.mxu2 %v754_v32 }
  0x3a   :  { %460 = vmatpush.bf16.msra.mxu3 %v762_v48  ;;  %539 = vmatpush.bf16.msrb.mxu0 %v776_v50 }
  0x3e   :  { %540 = vmatpush.bf16.msrb.mxu0 %v775_v51 }
  0x42   :  { %541 = vmatpush.bf16.msrb.mxu0 %v774_v52 }
  0x46   :  { %542 = vmatpush.bf16.msrb.mxu0 %v773_v61 }
  0x4a   :  { %543 = vmatpush.bf16.msrb.mxu0 %v772_v62 }
  0x4e   :  { %544 = vmatpush.bf16.msrb.mxu0 %v771_v63 }
  0x52   :  { %545 = vmatpush.bf16.msrb.mxu0 %v770_v0 }
  0xb2   :  { %v207_v21 = vpop.f32.mrf.mxu0 }
  0xb3   :  { %v208_v23 = vadd.f32 %v785_v22, %v207_v21 }
  0xb5   :  { %v212_v26 = vmax.f32 %v208_v23, 0.0 }
  0xba   :  { %v209_v24 = vpop.f32.mrf.mxu0 }
  0xbb   :  { %v210_v25 = vadd.f32 %v785_v22, %v209_v24 }
  0xbd   :  { %v213_v27 = vmax.f32 %v210_v25, 0.0 }
  0xbf   :  { %v214_v28 = vpack.c.bf16 %v213_v27, %v212_v26 }
  0xc1   :  { %291 = vmatmul.bf16.vlgmr.msra.gmra.mxu1 %v214_v28 }
 0x13e   :  { %v292_v37 = vpop.f32.mrf.mxu1 }
 0x13f   :  { %v293_v39 = vadd.f32 %v786_v38, %v292_v37 }
 0x141   :  { %v297_v42 = vmax.f32 %v293_v39, 0.0 }
 0x146   :  { %v294_v40 = vpop.f32.mrf.mxu1 }
 0x147   :  { %v295_v41 = vadd.f32 %v786_v38, %v294_v40 }
 0x149   :  { %v298_v43 = vmax.f32 %v295_v41, 0.0 }
 0x14b   :  { %v299_v44 = vpack.c.bf16 %v298_v43, %v297_v42 }
 0x14d   :  { %376 = vmatmul.bf16.vlgmr.msra.gmra.mxu2 %v299_v44 }
 0x1d0   :  { %v377_v53 = vpop.f32.mrf.mxu2 }
 0x1d1   :  { %v378_v55 = vadd.f32 %v787_v54, %v377_v53 }
 0x1d3   :  { %v382_v58 = vmax.f32 %v378_v55, 0.0 }
 0x1d8   :  { %v379_v56 = vpop.f32.mrf.mxu2 }
 0x1d9   :  { %v380_v57 = vadd.f32 %v787_v54, %v379_v56 }
 0x1db   :  { %v383_v59 = vmax.f32 %v380_v57, 0.0 }
 0x1dd   :  { %v384_v60 = vpack.c.bf16 %v383_v59, %v382_v58 }
 0x1df   :  { %461 = vmatmul.bf16.vlgmr.msra.gmra.mxu3 %v384_v60 }
 0x262   :  { %v462_v1 = vpop.f32.mrf.mxu3 }
 0x263   :  { %v463_v3 = vadd.f32 %v788_v2, %v462_v1 }
 0x265   :  { %v467_v6 = vmax.f32 %v463_v3, 0.0 }
 0x26a   :  { %v464_v4 = vpop.f32.mrf.mxu3 }
 0x26b   :  { %v465_v5 = vadd.f32 %v788_v2, %v464_v4 }
 0x26d   :  { %v468_v7 = vmax.f32 %v465_v5, 0.0 }
 0x26f   :  { %v469_v8 = vpack.c.bf16 %v468_v7, %v467_v6 }
 0x271   :  { %546 = vmatmul.bf16.vlgmr.msrb.gmra.mxu0 %v469_v8 }
 0x2ee   :  { %v547_v11 = vpop.f32.mrf.mxu0 }
 0x2ef   :  { %v548_v12 = vadd.f32 %v789_v9, %v547_v11 }
 0x2f1   :  { %v557_v14 = vmax.f32 %v790_v10, %v548_v12 }
 0x2f3   :  { %v562_v15 = vmin.f32 %v791_v13, %v557_v14 }
 0x2f5   :  { %564 = vst [vmem:[%s1053_s13] sm:$0xff] %v562_v15 }
 0x2f6   :  { %v549_v16 = vpop.f32.mrf.mxu0 }
 0x2f7   :  { %v550_v17 = vadd.f32 %v789_v9, %v549_v16 }
 0x2f9   :  { %v558_v18 = vmax.f32 %v790_v10, %v550_v17 }
 0x2fb   :  { %v563_v19 = vmin.f32 %v791_v13, %v558_v18 }
 0x2fd   :  { %565 = vst [vmem:[%s1053_s13 + $0x8] sm:$0xff] %v563_v19 }
 0x2fe   :  { %570 = vsyncpa [#allocation3], 1 }
 0x2ff   :  { %571 = vsyncpa [#allocation5], 1 }
 0x300   :  { %572 = vsyncpa [#allocation8], 1 }

</bundles_post_ra>
